<compile_context>
chip_gen: v7x
topology: tpu7x:2x2x1
jax: 0.10.0
libtpu: 0.0.40
codegen_flags: <defaults>
</compile_context>

<pallas_src>
import functools

import jax
import jax.numpy as jnp
import numpy as np
from jax.experimental import pallas as pl
from jax.experimental.pallas import tpu as pltpu


LUMA_COEFFS = {
    "rec601": (0.299, 0.587, 0.114),
    "rec709": (0.2126, 0.7152, 0.0722),
    "avg": (1.0 / 3.0, 1.0 / 3.0, 1.0 / 3.0),
}

_SB = 8                  # sublane rows per block (native (8,128) tile)
_HID = 16                # MLP hidden width per element
_TN_LEARN = 4096         # lane tile, learned CRF (MXU/compute-bound)
_TN_ELTWISE = 131072     # lane tile, gamma CRF (HBM-bound; 4 MiB f32 block)
_VMEM_LIMIT = 32 * 1024 * 1024


# ---------------------------------------------------------------------------
# Kernels
# ---------------------------------------------------------------------------
def _gamma_kernel(inv_gamma, x_ref, o_ref):
    # Elementwise pow on a dense (8, TN) block; cast-in / cast-out in-kernel.
    # TODO(synk): on v7x the f32 pow (exp+log on the single EUP slot) may become
    # the binding unit; a polynomial fit evaluated with VPU FMAs would keep the
    # path on the HBM roofline there.
    x = x_ref[...].astype(jnp.float32)
    o_ref[...] = (x ** inv_gamma).astype(o_ref.dtype)


def _learn_kernel(x_ref, w1_ref, b1_ref, w2_ref, b2_ref, w3_ref, b3_ref,
                  w4_ref, b4_ref, o_ref):
    """Learned CRF residual on a (8, TN) block.

    Hidden rows use the interleaved layout h[j*8 + r] = hidden unit j of
    sublane row r of the block:
      * layer 1 (fan-in 1 per element) : sublane concat + VPU FMA   (off MXU)
      * layers 2/3 (shared 16x16)      : kron(W, I8) bf16 MXU matmuls
      * layer 4 (fan-out 1 per element): VPU scale + segmented sublane sum
    Accumulation, biases, residual and sigmoid stay f32.
    """
    x = x_ref[...].astype(jnp.float32)                      # (8, TN) f32
    # ---- layer 1 (VPU) -----------------------------------------------------
    xe = jnp.concatenate([x] * _HID, axis=0)                # (128, TN): row j*8+r == x[r]
    h = jnp.maximum(w1_ref[...] * xe + b1_ref[...], 0.0).astype(jnp.bfloat16)
    # ---- layers 2/3 (MXU); bias+ReLU+cast fused into the feed of next dot ---
    h = jnp.maximum(
        jnp.dot(w2_ref[...], h, preferred_element_type=jnp.float32)
        + b2_ref[...], 0.0).astype(jnp.bfloat16)
    h = jnp.maximum(
        jnp.dot(w3_ref[...], h, preferred_element_type=jnp.float32)
        + b3_ref[...], 0.0)                                 # stays f32 (feeds VPU)
    # ---- layer 4 (VPU/VALU): scale by 0.1*w4, sum the 16 unit groups --------
    t = w4_ref[...] * h                                     # (128, TN) f32
    res = t[0:_SB, :]
    for g in range(1, _HID):
        res = res + t[g * _SB:(g + 1) * _SB, :]             # (8, TN)
    o_ref[...] = jax.nn.sigmoid(res + b4_ref[...] + x).astype(o_ref.dtype)


# ---------------------------------------------------------------------------
# Tiling helper + flat tonemap runner
# ---------------------------------------------------------------------------
def _choose_tn(cols, target):
    """Lane tile: multiple of 128, near-equal blocks, and an even block count
    (so the 1-D 'parallel' grid splits evenly across both v7x TensorCores)."""
    if cols <= 2 * 128:
        return cols                        # single full-width block (== array dim)
    num_blocks = 2 * pl.cdiv(cols, 2 * target)
    tn = pl.cdiv(pl.cdiv(cols, num_blocks), 128) * 128
    return min(max(tn, 128), cols)


def _ref_crf_learn(x, params):
    """Pure-JAX reference (and tiny-tail fallback) for the learned CRF."""
    w1, b1, w2, b2, w3, b3, w4, b4 = params
    xin = x.reshape(-1, 1)
    h = jnp.maximum(xin @ w1.T + b1[:, 0], 0.0)
    h = jnp.maximum(h @ w2.T + b2[:, 0], 0.0)
    h = jnp.maximum(h @ w3.T + b3[:, 0], 0.0)
    res = (h @ w4.T + b4[:, 0]) * 0.1
    return jax.nn.sigmoid(res + xin).reshape(x.shape)


@functools.partial(jax.jit, static_argnames=("map_type", "inv_gamma"))
def _tonemap(x, fused_params, raw_params, map_type, inv_gamma):
    """Apply the CRF elementwise to an arbitrarily-shaped floating tensor.

    The tensor is viewed as (8, numel//8) -- a free, layout-preserving reshape
    of the flat buffer -- and tiled along the lane dimension.  Casts to/from
    the original dtype happen inside the kernel (no extra HBM passes).
    """
    orig_shape = x.shape
    orig_dtype = x.dtype
    flat = x.reshape(-1)
    n = flat.shape[0]

    def tiny_crf(v):                       # plain-JAX path for <8-element tails
        v32 = v.astype(jnp.float32)
        if map_type == "learn":
            out = _ref_crf_learn(v32, raw_params)
        else:
            out = v32 ** inv_gamma
        return out.astype(orig_dtype)

    n_main = (n // _SB) * _SB
    if n_main == 0:
        return tiny_crf(flat).reshape(orig_shape)

    cols = n_main // _SB
    x2 = (flat if n_main == n else flat[:n_main]).reshape(_SB, cols)

    if map_type == "learn":
        tn = _choose_tn(cols, _TN_LEARN)
        kernel = _learn_kernel
        extra = list(fused_params)
    else:  # "gamma"
        tn = _choose_tn(cols, _TN_ELTWISE)
        kernel = functools.partial(_gamma_kernel, inv_gamma)
        extra = []

    grid = pl.cdiv(cols, tn)
    in_specs = [pl.BlockSpec((_SB, tn), lambda i: (0, i))]
    in_specs += [pl.BlockSpec(p.shape, lambda i: (0, 0)) for p in extra]

    out2 = pl.pallas_call(
        kernel,
        out_shape=jax.ShapeDtypeStruct((_SB, cols), orig_dtype),
        grid_spec=pltpu.PrefetchScalarGridSpec(
            num_scalar_prefetch=0,
            grid=(grid,),
            in_specs=in_specs,
            out_specs=pl.BlockSpec((_SB, tn), lambda i: (0, i)),
        ),
        compiler_params=pltpu.CompilerParams(
            dimension_semantics=("parallel",),
            vmem_limit_bytes=_VMEM_LIMIT,
        ),
    )(x2, *extra)

    out_flat = out2.reshape(-1)
    if n_main != n:
        # TODO(synk): rare numel % 8 != 0 fallback; the <=7-element tail is a
        # trivial XLA op (no full-tensor pad/slice copies).
        out_flat = jnp.concatenate([out_flat, tiny_crf(flat[n_main:])])
    return out_flat.reshape(orig_shape)


# ---------------------------------------------------------------------------
# Parameter init (mimics nn.Linear default U(-1/sqrt(fan_in), +)) + packing
# ---------------------------------------------------------------------------
def init_crf_mlp_params(key):
    # Linear(1,16) -> ReLU -> Linear(16,16) -> ReLU -> Linear(16,16) -> ReLU -> Linear(16,1)
    dims = [(_HID, 1), (_HID, _HID), (_HID, _HID), (1, _HID)]  # (out, in)
    params = []
    for out_d, in_d in dims:
        bound = 1.0 / np.sqrt(in_d)
        key, kw, kb = jax.random.split(key, 3)
        w = jax.random.uniform(kw, (out_d, in_d), jnp.float32, -bound, bound)
        b = jax.random.uniform(kb, (out_d, 1), jnp.float32, -bound, bound)
        params += [w, b]
    return tuple(params)


def build_fused_params(params, n_rows=_SB):
    """Pack the shared 16-unit MLP for the fused (n_rows, TN)-block kernel.

    Hidden rows use the interleaved layout h[j*n_rows + r] = unit j of sublane
    row r, so layers 1/4 run on the VPU with (128, 1) column vectors and layers
    2/3 are kron(W, I_{n_rows}) bf16 MXU matmuls that preserve the layout.
    The residual scale 0.1 is folded into the layer-4 weights/bias.
    """
    w1, b1, w2, b2, w3, b3, w4, b4 = params
    eye = jnp.eye(n_rows, dtype=jnp.float32)

    def col(v):      # (16,) -> (16*n_rows, 1): value j repeated n_rows times
        return jnp.repeat(v.reshape(-1), n_rows).reshape(-1, 1).astype(jnp.float32)

    def kron_i(w):   # (16,16) -> (128,128) bf16, kron(W, I_{n_rows})
        return jnp.kron(w, eye).astype(jnp.bfloat16)

    return (col(w1[:, 0]), col(b1[:, 0]),                 # (128,1) f32, (128,1) f32
            kron_i(w2),    col(b2[:, 0]),                 # (128,128) bf16, (128,1) f32
            kron_i(w3),    col(b3[:, 0]),                 # (128,128) bf16, (128,1) f32
            col(w4[0, :] * 0.1),                          # (128,1) f32 (0.1 folded)
            jnp.full((n_rows, 1), b4[0, 0] * 0.1, jnp.float32))  # (8,1) f32


# ---------------------------------------------------------------------------
# Module wrapper (mirrors TonemappingTransform / CRF forward semantics)
# ---------------------------------------------------------------------------
class TonemappingTransformPallas:
    def __init__(self, map_type_rgb, map_type_event, gamma=2.2,
                 luma_standard="rec601", key=None):
        assert map_type_rgb in ["none", "gamma", "learn"]
        assert map_type_event in ["none", "gamma", "learn"]
        assert luma_standard in ["rec601", "rec709", "avg"]
        self.map_type_rgb = map_type_rgb
        self.map_type_event = map_type_event
        self.inv_gamma = 1.0 / gamma
        self.luma_standard = luma_standard
        key = key if key is not None else jax.random.PRNGKey(0)
        k_rgb, k_ev = jax.random.split(key)
        # TODO(synk): extra_features>0 and init_identity (Adam pre-training) not implemented.
        self.rgb_params = init_crf_mlp_params(k_rgb)
        self.event_params = init_crf_mlp_params(k_ev)
        self.rgb_fused = build_fused_params(self.rgb_params)
        self.event_fused = build_fused_params(self.event_params)

    # ---- helpers -----------------------------------------------------------
    @staticmethod
    def _effective_map_type(map_type, skip_learn):
        if skip_learn and map_type == "learn":
            return "none"  # 'learn' has no gamma pre-step in the original CRF
        return map_type

    def _apply_crf(self, x, map_type, fused, raw, skip_learn):
        mt = self._effective_map_type(map_type, skip_learn)
        if mt == "none":
            return x
        # TODO(synk): integer image dtypes are not supported (matches PyTorch,
        # where pow of an int tensor by a float exponent also errors).
        assert jnp.issubdtype(x.dtype, jnp.floating)
        if mt == "learn":
            return _tonemap(x, fused, raw, map_type="learn", inv_gamma=self.inv_gamma)
        return _tonemap(x, None, None, map_type="gamma", inv_gamma=self.inv_gamma)

    # ---- CRF.forward equivalents -------------------------------------------
    def encode_rgb(self, x, skip_learn_crf=False, **kwargs):
        assert x.shape[-1] == 3
        return self._apply_crf(x, self.map_type_rgb, self.rgb_fused,
                               self.rgb_params, skip_learn_crf)

    def encode_luma(self, x, keep_rgb=False, tonemap_only=False,
                    skip_learn_crf=False, **kwargs):
        y = self._apply_crf(x, self.map_type_event, self.event_fused,
                            self.event_params, skip_learn_crf)
        if not tonemap_only:
            assert x.shape[-1] == 3
            c0, c1, c2 = LUMA_COEFFS[self.luma_standard]
            # TODO(synk): luma weighted sum is a separate XLA elementwise pass
            # (a C=3-lane in-kernel epilogue would waste 125/128 lanes); rely on
            # XLA fusion here.
            y = c0 * y[..., 0:1] + c1 * y[..., 1:2] + c2 * y[..., 2:3]
            if keep_rgb:
                y = jnp.concatenate([y] * 3, axis=-1)
        return y

    # ---- TonemappingTransform.forward --------------------------------------
    def forward(self, x, mode="encode_rgb", chunk=None, **kwargs):
        chunk = chunk or max(1, x.shape[0])
        outs = []
        for i in range(0, max(1, x.shape[0]), chunk):
            x_chunk = x[i:i + chunk]
            if mode == "encode_rgb":
                outs.append(self.encode_rgb(x_chunk, **kwargs))
            elif mode == "encode_luma":
                outs.append(self.encode_luma(x_chunk, **kwargs))
            else:
                raise RuntimeError(f"mode '{mode}' not recognized")
        return jnp.concatenate(outs, axis=0)


if __name__ == "__main__":
    key = jax.random.PRNGKey(0)
    k_x, k_p = jax.random.split(key)
    # Small NHWC input, channels-last (the module indexes x[..., c]).
    x = jax.random.uniform(k_x, (2, 16, 16, 3), jnp.float32)

    model = TonemappingTransformPallas(
        map_type_rgb="gamma", map_type_event="learn",
        gamma=2.2, luma_standard="rec601", key=k_p)

    y_rgb = model.forward(x, mode="encode_rgb")                       # gamma CRF
    y_luma = model.forward(x, mode="encode_luma")                     # learn CRF + rec601
    y_tm = model.forward(x, mode="encode_luma", tonemap_only=True)    # learn CRF only
    # bf16 input exercises the in-kernel cast-in / cast-out path.
    x_bf16 = x.astype(jnp.bfloat16)
    y_rgb_bf16 = model.forward(x_bf16, mode="encode_rgb")
    # numel % 8 != 0 exercises the tiny-tail fallback (no pad/slice copies).
    x_ragged = x.reshape(-1, 3)[:5]                                   # (5, 3) = 15 elems
    y_ragged = model.forward(x_ragged, mode="encode_rgb")
    jax.block_until_ready((y_rgb, y_luma, y_tm, y_rgb_bf16, y_ragged))

    inv_gamma = 1.0 / 2.2
    ref_rgb = x ** inv_gamma
    y_crf = _ref_crf_learn(x, model.event_params)
    ref_luma = (0.299 * y_crf[..., 0:1]
                + 0.587 * y_crf[..., 1:2]
                + 0.114 * y_crf[..., 2:3])

    assert y_rgb.shape == (2, 16, 16, 3)
    assert y_luma.shape == (2, 16, 16, 1)
    assert y_tm.shape == (2, 16, 16, 3)
    assert y_rgb_bf16.dtype == jnp.bfloat16 and y_rgb_bf16.shape == x.shape
    assert y_ragged.shape == (5, 3)
    assert np.allclose(np.asarray(y_rgb), np.asarray(ref_rgb), atol=1e-4)
    # Learned CRF: layer-2/3 weights + hidden activations run in bf16 on the MXU,
    # so the learned path is bf16-accurate (~1e-3), not f32-exact.
    assert np.allclose(np.asarray(y_luma), np.asarray(ref_luma), atol=2e-3)
    assert np.allclose(np.asarray(y_tm), np.asarray(y_crf), atol=2e-3)
    assert np.allclose(np.asarray(y_rgb_bf16, dtype=np.float32),
                       np.asarray(x_bf16.astype(jnp.float32) ** inv_gamma),
                       atol=1e-2)
    assert np.allclose(np.asarray(y_ragged), np.asarray(x_ragged ** inv_gamma),
                       atol=1e-4)

    print("KERNEL_OK")
</pallas_src>

<mosaic_0001>
module attributes {stable_mosaic.version = 11 : i64} {
  func.func @_gamma_kernel(%arg0: i32, %arg1: memref<8x192xf32, #tpu.memory_space<vmem>>, %arg2: memref<8x192xf32, #tpu.memory_space<vmem>>) attributes {dimension_semantics = [#tpu.dimension_semantics<parallel>], iteration_bounds = array<i64: 1>, scalar_prefetch = 0 : i64, scratch_operands = 0 : i64, tpu.core_type = #tpu.core_type<tc>, window_params = [{transform_indices = @transform_0, window_bounds = array<i64: 8, 192>}, {transform_indices = @transform_1, window_bounds = array<i64: 8, 192>}]} {
    %c0 = arith.constant 0 : index
    %c0_0 = arith.constant 0 : index
    %0 = vector.load %arg1[%c0, %c0_0] : memref<8x192xf32, #tpu.memory_space<vmem>>, vector<8x192xf32>
    %cst = arith.constant 0.454545468 : f32
    %1 = vector.broadcast %cst : f32 to vector<8x192xf32>
    %2 = math.powf %0, %1 : vector<8x192xf32>
    %c0_1 = arith.constant 0 : index
    %c0_2 = arith.constant 0 : index
    %3 = vector.load %arg2[%c0_1, %c0_2] : memref<8x192xf32, #tpu.memory_space<vmem>>, vector<8x192xf32>
    tpu.vector_store %arg2[%c0_1, %c0_2], %2 {strides = array<i32>} : memref<8x192xf32, #tpu.memory_space<vmem>>, vector<8x192xf32>,
    return
  }
  func.func @transform_0(%arg0: i32) -> (i32, i32) {
    %c0_i32 = arith.constant 0 : i32
    %c0_i32_0 = arith.constant 0 : i32
    return %c0_i32, %arg0 : i32, i32
  }
  func.func @transform_1(%arg0: i32) -> (i32, i32) {
    %c0_i32 = arith.constant 0 : i32
    %c0_i32_0 = arith.constant 0 : i32
    return %c0_i32, %arg0 : i32, i32
  }
}

</mosaic_0001>

<bundles_post_ra>
// kernel: _tonemap.1
= control target key start
LH: loop header
LB: loop body
LE: loop exit
PB: predicated region body
PF: predicated region fallthrough
CT: control target
= control target key end

     0   :  { %vm13_vm10 = vcmask 523264   ;;  %s101_s0 = inlined_call_operand.vmem [shape: f32[8,192], index: 0, kind: input, shape index: {}]   ;;  %s102_s1 = inlined_call_operand.vmem [shape: f32[8,192], index: 1, kind: output, shape index: {}]  }
   0x1   :  { %v8_v0 = vld [vmem:[%s101_s0] sm:$0xff]  ;;  %v9_v1 = vld [vmem:[%s101_s0 + $0x8] sm:$0xff] }
   0x2   :  { %v23_v2 = vand.u32 2147483647, %v8_v0  ;;  %v49_v3 = vand.u32 2147483647, %v9_v1  ;;  %vm27_vm0 = vcmp.lt.f32.partialorder %v8_v0, 0  ;;  %vm28_vm1 = vcmp.eq.f32.partialorder %v8_v0, 0 }
   0x3   :  { %vm53_vm2 = vcmp.lt.f32.partialorder %v9_v1, 0  ;;  %vm54_vm4 = vcmp.eq.f32.partialorder %v9_v1, 0  ;;  %vm40_vm5 = vcmp.ne.f32.partialorder %v8_v0, %v8_v0  ;;  %vm29_vm7 = vcmp.eq.f32.partialorder %v8_v0, 1065353216 }
   0x4   :  { %71 = vlog2.f32 %v23_v2  ;;  %vm32_vm3 = vcmp.eq.f32.partialorder %v23_v2, 2139095040  ;;  %vm58_vm6 = vcmp.eq.f32.partialorder %v49_v3, 2139095040  ;;  %vm66_vm8 = vcmp.ne.f32.partialorder %v9_v1, %v9_v1 }
   0x5   :  { %73 = vlog2.f32 %v49_v3  ;;  %vm55_vm9 = vcmp.eq.f32.partialorder %v9_v1, 1065353216 }
   0xe   :  { %v72_v4 = vpop.eup %71 }
   0xf   :  { %v74_v5 = vpop.eup %73  ;;  %v25_v6 = vmul.f32 0.45454547, %v72_v4 }
  0x10   :  { %v51_v7 = vmul.f32 0.45454547, %v74_v5 }
  0x11   :  { %75 = vpow2.f32 %v25_v6 }
  0x12   :  { %77 = vpow2.f32 %v51_v7 }
  0x1b   :  { %v76_v8 = vpop.eup %75 }
  0x1c   :  { %v78_v9 = vpop.eup %77  ;;  %v33_v10 = vsel %vm27_vm0, 2143289344, %v76_v8 }
  0x1d   :  { %v34_v11 = vsel %vm28_vm1, 0, %v33_v10  ;;  %v59_v12 = vsel %vm53_vm2, 2143289344, %v78_v9 }
  0x1e   :  { %v39_v13 = vsel %vm32_vm3, 2139095040, %v34_v11  ;;  %v60_v14 = vsel %vm54_vm4, 0, %v59_v12 }
  0x1f   :  { %v43_v15 = vsel %vm40_vm5, 2143289344, %v39_v13  ;;  %v65_v16 = vsel %vm58_vm6, 2139095040, %v60_v14 }
  0x20   :  { %v44_v17 = vsel %vm29_vm7, 1065353216, %v43_v15  ;;  %v69_v18 = vsel %vm66_vm8, 2143289344, %v65_v16 }
  0x21   :  { %12 = vst [vmem:[%s102_s1] sm:$0xff] %v44_v17  ;;  %v70_v19 = vsel %vm55_vm9, 1065353216, %v69_v18 }
  0x22   :  { %14 = vst.msk [vmem:[%s102_s1 + $0x8] sm:$0xff] %vm13_vm10, %v70_v19 }

</bundles_post_ra>
